<compile_context>
chip_gen: v7x
topology: tpu7x:2x2x1
jax: 0.10.0
libtpu: 0.0.40
codegen_flags: <defaults>
</compile_context>

<pallas_src>
import functools

import jax
import jax.numpy as jnp
from jax.experimental import pallas as pl
from jax.experimental.pallas import tpu as pltpu

EPS = 1e-5           # nn.LayerNorm default
_LANE = 128
_SUBLANE = 8
_TR_MAX = 1024       # rows per grid step at the mem-bound sweet spot
_MIN_STEPS = 16      # ~8 grid steps per TensorCore on v7x (2 TCs)


def _round_up(a, m):
    return (a + m - 1) // m * m


def _vmem_capacity_bytes():
    try:
        return int(pltpu.get_tpu_info().vmem_capacity_bytes)
    except Exception:
        return 64 * 1024 * 1024   # conservative fallback, valid on every generation


def _const_spec(block_shape, single_buffer):
    """BlockSpec for an operand whose block index is constant across the grid."""
    index_map = lambda *_: (0,) * len(block_shape)
    if single_buffer:
        # Constant index -> a second pipeline buffer is pure VMEM waste.
        return pl.BlockSpec(block_shape, index_map, pipeline_mode=pl.Buffered(1))
    return pl.BlockSpec(block_shape, index_map)


# ----------------------------- kernels ---------------------------------------
def _prenorm_kernel(x_ref, wt_ref, b_ref, o_ref, *, inv_d):
    """One (TR, D) row tile: LayerNorm (f32 stats, one pass) then one MXU matmul.

    gamma/beta are pre-folded into wt/b, W^T is pre-transposed / pre-cast and
    zero-padded on the output dim only, so the kernel is normalize -> dot -> bias.
    """
    x = x_ref[...].astype(jnp.float32)                       # (TR, D), unpadded lanes
    mean = jnp.sum(x, axis=-1, keepdims=True) * inv_d
    var = jnp.maximum(jnp.sum(x * x, axis=-1, keepdims=True) * inv_d - mean * mean, 0.0)
    xn = (x - mean) * jax.lax.rsqrt(var + EPS)
    acc = jnp.dot(xn.astype(wt_ref.dtype), wt_ref[...],
                  preferred_element_type=jnp.float32)
    o_ref[...] = (acc + b_ref[...]).astype(o_ref.dtype)


def _prenorm_kernel_ktiled(xa_ref, xb_ref, wt_ref, b_ref, o_ref,
                           mean_ref, rstd_ref, acc_ref, *, inv_d):
    """Large-D path: stream (TK, Dp) weight tiles over grid axis k, f32 accumulator.

    xa (full rows, constant index across k -> DMA'd once per row tile) provides the
    LayerNorm statistics at k==0; xb is the matching (TR, TK) slice of x for the
    matmul. Padded x lanes contribute nothing because the corresponding W rows are 0.
    """
    k = pl.program_id(1)

    @pl.when(k == 0)
    def _():
        x = xa_ref[...].astype(jnp.float32)                  # zero-padded lanes
        mean = jnp.sum(x, axis=-1, keepdims=True) * inv_d
        var = jnp.maximum(jnp.sum(x * x, axis=-1, keepdims=True) * inv_d - mean * mean,
                          0.0)
        mean_ref[...] = mean
        rstd_ref[...] = jax.lax.rsqrt(var + EPS)
        acc_ref[...] = jnp.zeros_like(acc_ref)

    xn = (xb_ref[...].astype(jnp.float32) - mean_ref[...]) * rstd_ref[...]
    acc_ref[...] += jnp.dot(xn.astype(wt_ref.dtype), wt_ref[...],
                            preferred_element_type=jnp.float32)

    @pl.when(k == pl.num_programs(1) - 1)
    def _():
        o_ref[...] = (acc_ref[...] + b_ref[...]).astype(o_ref.dtype)


# ----------------------------- wrapper ----------------------------------------
def prenorm_linear(x, gamma, beta, w, b, *, matmul_dtype=jnp.bfloat16,
                   max_resident_weight_bytes=None, k_tile=512):
    """PreNorm(dim, Linear(dim, dim)): x[B, N, D] -> Linear(LayerNorm(x))."""
    B, N, D = x.shape
    R = B * N
    Dp = _round_up(D, _LANE)        # lane-dense output dim (unmasked vst)

    # ---- one-time XLA-side prep --------------------------------------------
    # Fold the LayerNorm affine into the linear:
    #   (xn * gamma + beta) @ W^T + b == xn @ (gamma[:, None] * W^T) + (beta @ W^T + b)
    wt = w.T.astype(jnp.float32)                                   # (in, out)
    wt_folded = (gamma.astype(jnp.float32)[:, None] * wt).astype(matmul_dtype)
    b_folded = beta.astype(jnp.float32) @ wt + b.astype(jnp.float32)
    if Dp != D:
        # Pad ONLY the output dim of W / bias; x stays unpadded (no extra HBM pass).
        wt_folded = jnp.pad(wt_folded, ((0, 0), (0, Dp - D)))
        b_folded = jnp.pad(b_folded, ((0, Dp - D),))
    b_folded = b_folded.reshape(1, Dp)

    x2 = x.reshape(R, D)

    itm_x = jnp.dtype(x.dtype).itemsize
    itm_w = jnp.dtype(matmul_dtype).itemsize

    cap = _vmem_capacity_bytes()
    cap_eff = int(0.8 * cap)        # headroom for compiler-internal scratch (esp. v7x)
    if max_resident_weight_bytes is None:
        max_resident_weight_bytes = int(0.7 * cap_eff)

    w_bytes = D * Dp * itm_w
    use_ktiling = w_bytes > max_resident_weight_bytes
    inv_d = 1.0 / D

    if not use_ktiling:
        # ---------------- resident-weight path (typical dims) ----------------
        row_bytes = 2 * D * itm_x + 2 * Dp * itm_x      # x + out, double-buffered
        if R <= 256:
            TR = R                                      # single block; full-dim exception
        else:
            budget = max(cap_eff - w_bytes - 2 * Dp * 4 - (2 << 20),
                         row_bytes * _SUBLANE)
            TR = min(_TR_MAX, budget // row_bytes)
            TR = max(_SUBLANE, (TR // _SUBLANE) * _SUBLANE)
            # Keep enough grid steps for pipelining / dual-TC sharding on v7x,
            # but never shrink the tile below 256 rows just for step count.
            TR = min(TR, max(256, _round_up(pl.cdiv(R, _MIN_STEPS), _SUBLANE)))
            TR = min(TR, _round_up(R, _SUBLANE))
        grid = (pl.cdiv(R, TR),)
        kernel = functools.partial(_prenorm_kernel, inv_d=inv_d)

        def run(single_buffer):
            nbuf_w = 1 if single_buffer else 2
            est = (2 * TR * D * itm_x + 2 * TR * Dp * itm_x
                   + nbuf_w * (D * Dp * itm_w + Dp * 4))
            vlim = int(min(max(int(1.2 * est) + (2 << 20), 32 << 20), cap_eff))
            return pl.pallas_call(
                kernel,
                out_shape=jax.ShapeDtypeStruct((R, Dp), x.dtype),
                grid_spec=pltpu.PrefetchScalarGridSpec(
                    num_scalar_prefetch=0,
                    grid=grid,
                    in_specs=[
                        pl.BlockSpec((TR, D), lambda i: (i, 0)),   # rows (pipelined)
                        _const_spec((D, Dp), single_buffer),       # resident folded W^T
                        _const_spec((1, Dp), single_buffer),       # folded bias
                    ],
                    out_specs=pl.BlockSpec((TR, Dp), lambda i: (i, 0)),
                ),
                compiler_params=pltpu.CompilerParams(
                    dimension_semantics=("parallel",),
                    vmem_limit_bytes=vlim,
                ),
            )(x2, wt_folded, b_folded)

        try:
            out2 = run(True)      # single-buffer the constant-index weight/bias
        except Exception:
            out2 = run(False)     # fallback if pipeline_mode / Buffered(1) unsupported
    else:
        # ---------------- K-tiled path (very large D, mainly v7x) ------------
        TK = max(_LANE, _round_up(min(k_tile, Dp), _LANE))
        Dx = _round_up(D, TK)
        x2p = x2 if Dx == D else jnp.pad(x2, ((0, 0), (0, Dx - D)))
        wt_k = wt_folded if Dx == D else jnp.pad(wt_folded, ((0, Dx - D), (0, 0)))
        nk = Dx // TK

        per_row = (2 * Dx + 2 * TK + 2 * Dp) * itm_x + Dp * 4 + 16
        budget = max(cap_eff - 2 * TK * Dp * itm_w - 2 * Dp * 4 - (2 << 20),
                     per_row * _SUBLANE)
        TR = min(512, budget // per_row)
        TR = max(_SUBLANE, (TR // _SUBLANE) * _SUBLANE)
        TR = min(TR, _round_up(R, _SUBLANE))
        grid = (pl.cdiv(R, TR), nk)
        kernel = functools.partial(_prenorm_kernel_ktiled, inv_d=inv_d)

        def run(single_buffer):
            nbuf_b = 1 if single_buffer else 2
            est = ((2 * TR * Dx + 2 * TR * TK + 2 * TR * Dp) * itm_x
                   + 2 * TK * Dp * itm_w + TR * Dp * 4 + nbuf_b * Dp * 4 + 4 * TR * 4)
            vlim = int(min(max(int(1.2 * est) + (2 << 20), 32 << 20), cap_eff))
            return pl.pallas_call(
                kernel,
                out_shape=jax.ShapeDtypeStruct((R, Dp), x.dtype),
                grid_spec=pltpu.PrefetchScalarGridSpec(
                    num_scalar_prefetch=0,
                    grid=grid,
                    in_specs=[
                        pl.BlockSpec((TR, Dx), lambda i, k: (i, 0)),  # full rows (stats)
                        pl.BlockSpec((TR, TK), lambda i, k: (i, k)),  # K tile (matmul)
                        pl.BlockSpec((TK, Dp), lambda i, k: (k, 0)),  # streamed weight
                        _const_spec((1, Dp), single_buffer),          # folded bias
                    ],
                    out_specs=pl.BlockSpec((TR, Dp), lambda i, k: (i, 0)),
                    scratch_shapes=[pltpu.VMEM((TR, 1), jnp.float32),   # mean
                                    pltpu.VMEM((TR, 1), jnp.float32),   # rstd
                                    pltpu.VMEM((TR, Dp), jnp.float32)], # f32 accumulator
                ),
                compiler_params=pltpu.CompilerParams(
                    dimension_semantics=("parallel", "arbitrary"),
                    vmem_limit_bytes=vlim,
                ),
            )(x2p, x2p, wt_k, b_folded)

        try:
            out2 = run(True)
        except Exception:
            out2 = run(False)

    if Dp != D:
        # TODO(synk): skip this slice (one extra HBM pass) when the downstream
        # consumer can accept a (B, N, Dp) zero-padded output.
        out2 = out2[:, :D]
    return out2.reshape(B, N, D)


# ----------------------------- references -------------------------------------
def reference_f32(x, gamma, beta, w, b):
    """Pure-f32 PyTorch semantics: Linear(LayerNorm(x))."""
    xf = x.astype(jnp.float32)
    mean = jnp.mean(xf, axis=-1, keepdims=True)
    var = jnp.mean((xf - mean) ** 2, axis=-1, keepdims=True)
    y = (xf - mean) / jnp.sqrt(var + EPS) * gamma + beta
    return (y @ w.T.astype(jnp.float32) + b).astype(x.dtype)


def reference_bf16_mirror(x, gamma, beta, w, b):
    """Mirrors the kernel's bf16-MXU path (gamma/beta fold, bf16 operands, f32 acc)."""
    xf = x.astype(jnp.float32)
    mean = jnp.mean(xf, axis=-1, keepdims=True)
    var = jnp.mean((xf - mean) ** 2, axis=-1, keepdims=True)
    xn = (xf - mean) * jax.lax.rsqrt(var + EPS)
    wt = w.T.astype(jnp.float32)
    wt_folded = (gamma[:, None] * wt).astype(jnp.bfloat16)
    b_folded = beta @ wt + b
    out = jnp.dot(xn.astype(jnp.bfloat16), wt_folded,
                  preferred_element_type=jnp.float32) + b_folded
    return out.astype(x.dtype)


if __name__ == "__main__":
    key = jax.random.PRNGKey(0)

    # ---- Test 1: resident-weight path (typical small dims) -------------------
    B, N, D = 2, 8, 32
    kx, kg, kbt, kw, kb = jax.random.split(key, 5)
    x = jax.random.normal(kx, (B, N, D), dtype=jnp.float32)
    gamma = 1.0 + 0.1 * jax.random.normal(kg, (D,), dtype=jnp.float32)
    beta = 0.1 * jax.random.normal(kbt, (D,), dtype=jnp.float32)
    w = jax.random.normal(kw, (D, D), dtype=jnp.float32) * 0.05
    b = jax.random.normal(kb, (D,), dtype=jnp.float32) * 0.05

    ref = reference_f32(x, gamma, beta, w, b)
    out_f32 = jax.block_until_ready(
        prenorm_linear(x, gamma, beta, w, b, matmul_dtype=jnp.float32))
    assert out_f32.shape == (B, N, D)
    assert jnp.max(jnp.abs(out_f32 - ref)) < 1e-4

    out_bf16 = jax.block_until_ready(prenorm_linear(x, gamma, beta, w, b))
    ref_bf16 = reference_bf16_mirror(x, gamma, beta, w, b)
    assert jnp.max(jnp.abs(out_bf16 - ref_bf16)) < 1e-2
    assert jnp.max(jnp.abs(out_bf16 - ref)) < 5e-2

    # ---- Test 2: force the K-tiled (large-D / v7x) path at small shapes -------
    B2, N2, D2 = 2, 24, 200     # D2 % 128 != 0 -> also exercises the padded-lane logic
    kx2, kg2, kbt2, kw2, kb2 = jax.random.split(jax.random.PRNGKey(1), 5)
    x2 = jax.random.normal(kx2, (B2, N2, D2), dtype=jnp.float32)
    gamma2 = 1.0 + 0.1 * jax.random.normal(kg2, (D2,), dtype=jnp.float32)
    beta2 = 0.1 * jax.random.normal(kbt2, (D2,), dtype=jnp.float32)
    w2 = jax.random.normal(kw2, (D2, D2), dtype=jnp.float32) * 0.05
    b2 = jax.random.normal(kb2, (D2,), dtype=jnp.float32) * 0.05

    ref2 = reference_f32(x2, gamma2, beta2, w2, b2)
    out2_f32 = jax.block_until_ready(
        prenorm_linear(x2, gamma2, beta2, w2, b2, matmul_dtype=jnp.float32,
                       max_resident_weight_bytes=0, k_tile=128))
    assert out2_f32.shape == (B2, N2, D2)
    assert jnp.max(jnp.abs(out2_f32 - ref2)) < 1e-3

    out2_bf16 = jax.block_until_ready(
        prenorm_linear(x2, gamma2, beta2, w2, b2,
                       max_resident_weight_bytes=0, k_tile=128))
    assert jnp.max(jnp.abs(out2_bf16 - ref2)) < 5e-2

    print("KERNEL_OK")
</pallas_src>

<mosaic_0001>
module attributes {stable_mosaic.version = 11 : i64} {
  func.func @_prenorm_kernel(%arg0: i32, %arg1: memref<16x32xf32, #tpu.memory_space<vmem>>, %arg2: memref<32x128xf32, #tpu.memory_space<vmem>>, %arg3: memref<1x128xf32, #tpu.memory_space<vmem>>, %arg4: memref<16x128xf32, #tpu.memory_space<vmem>>) attributes {dimension_semantics = [#tpu.dimension_semantics<parallel>], iteration_bounds = array<i64: 1>, scalar_prefetch = 0 : i64, scratch_operands = 0 : i64, tpu.core_type = #tpu.core_type<tc>, window_params = [{transform_indices = @transform_0, window_bounds = array<i64: 16, 32>}, {pipeline_mode = #tpu.pipeline_mode<synchronous>, transform_indices = @transform_1, window_bounds = array<i64: 32, 128>}, {pipeline_mode = #tpu.pipeline_mode<synchronous>, transform_indices = @transform_2, window_bounds = array<i64: 1, 128>}, {transform_indices = @transform_3, window_bounds = array<i64: 16, 128>}]} {
    %c0 = arith.constant 0 : index
    %c0_0 = arith.constant 0 : index
    %0 = vector.load %arg1[%c0, %c0_0] : memref<16x32xf32, #tpu.memory_space<vmem>>, vector<16x32xf32>
    %cst = arith.constant dense<0.000000e+00> : vector<16xf32>
    %1 = vector.multi_reduction <add>, %0, %cst [1] : vector<16x32xf32> to vector<16xf32>
    %2 = vector.shape_cast %1 : vector<16xf32> to vector<16x1xf32>
    %cst_1 = arith.constant 3.125000e-02 : f32
    %3 = vector.broadcast %cst_1 : f32 to vector<16x1xf32>
    %4 = arith.mulf %2, %3 : vector<16x1xf32>
    %5 = arith.mulf %0, %0 : vector<16x32xf32>
    %cst_2 = arith.constant dense<0.000000e+00> : vector<16xf32>
    %6 = vector.multi_reduction <add>, %5, %cst_2 [1] : vector<16x32xf32> to vector<16xf32>
    %7 = vector.shape_cast %6 : vector<16xf32> to vector<16x1xf32>
    %cst_3 = arith.constant 3.125000e-02 : f32
    %8 = vector.broadcast %cst_3 : f32 to vector<16x1xf32>
    %9 = arith.mulf %7, %8 : vector<16x1xf32>
    %10 = arith.mulf %4, %4 : vector<16x1xf32>
    %11 = arith.subf %9, %10 : vector<16x1xf32>
    %cst_4 = arith.constant 0.000000e+00 : f32
    %12 = vector.broadcast %cst_4 : f32 to vector<16x1xf32>
    %13 = arith.maximumf %11, %12 : vector<16x1xf32>
    %14 = vector.broadcast %4 : vector<16x1xf32> to vector<16x32xf32>
    %15 = arith.subf %0, %14 : vector<16x32xf32>
    %cst_5 = arith.constant 9.99999974E-6 : f32
    %16 = vector.broadcast %cst_5 : f32 to vector<16x1xf32>
    %17 = arith.addf %13, %16 : vector<16x1xf32>
    %18 = math.rsqrt %17 : vector<16x1xf32>
    %19 = vector.broadcast %18 : vector<16x1xf32> to vector<16x32xf32>
    %20 = arith.mulf %15, %19 : vector<16x32xf32>
    %c0_6 = arith.constant 0 : index
    %c0_7 = arith.constant 0 : index
    %21 = vector.load %arg2[%c0_6, %c0_7] : memref<32x128xf32, #tpu.memory_space<vmem>>, vector<32x128xf32>
    %cst_8 = arith.constant dense<0.000000e+00> : vector<16x128xf32>
    %22 = tpu.matmul %20, %21, %cst_8 {dimension_numbers = #tpu.dot_dimension_numbers<[1], [0], [0], [1], [0, 0, 1, 1], [], []>} : vector<16x32xf32>, vector<32x128xf32>, vector<16x128xf32> -> vector<16x128xf32>
    %c0_9 = arith.constant 0 : index
    %c0_10 = arith.constant 0 : index
    %23 = vector.load %arg3[%c0_9, %c0_10] : memref<1x128xf32, #tpu.memory_space<vmem>>, vector<1x128xf32>
    %24 = vector.broadcast %23 : vector<1x128xf32> to vector<16x128xf32>
    %25 = arith.addf %22, %24 : vector<16x128xf32>
    %c0_11 = arith.constant 0 : index
    %c0_12 = arith.constant 0 : index
    %26 = vector.load %arg4[%c0_11, %c0_12] : memref<16x128xf32, #tpu.memory_space<vmem>>, vector<16x128xf32>
    tpu.vector_store %arg4[%c0_11, %c0_12], %25 {strides = array<i32>} : memref<16x128xf32, #tpu.memory_space<vmem>>, vector<16x128xf32>,
    return
  }
  func.func @transform_0(%arg0: i32) -> (i32, i32) {
    %c0_i32 = arith.constant 0 : i32
    %c0_i32_0 = arith.constant 0 : i32
    return %arg0, %c0_i32 : i32, i32
  }
  func.func @transform_1(%arg0: i32) -> (i32, i32) {
    %c0_i32 = arith.constant 0 : i32
    %c0_i32_0 = arith.constant 0 : i32
    %c0_i32_1 = arith.constant 0 : i32
    return %c0_i32, %c0_i32_0 : i32, i32
  }
  func.func @transform_2(%arg0: i32) -> (i32, i32) {
    %c0_i32 = arith.constant 0 : i32
    %c0_i32_0 = arith.constant 0 : i32
    %c0_i32_1 = arith.constant 0 : i32
    return %c0_i32, %c0_i32_0 : i32, i32
  }
  func.func @transform_3(%arg0: i32) -> (i32, i32) {
    %c0_i32 = arith.constant 0 : i32
    %c0_i32_0 = arith.constant 0 : i32
    return %arg0, %c0_i32 : i32, i32
  }
}

module attributes {stable_mosaic.version = 11 : i64} {
  func.func @_prenorm_kernel(%arg0: i32, %arg1: memref<16x32xf32, #tpu.memory_space<vmem>>, %arg2: memref<32x128xf32, #tpu.memory_space<vmem>>, %arg3: memref<1x128xf32, #tpu.memory_space<vmem>>, %arg4: memref<16x128xf32, #tpu.memory_space<vmem>>) attributes {dimension_semantics = [#tpu.dimension_semantics<parallel>], iteration_bounds = array<i64: 1>, scalar_prefetch = 0 : i64, scratch_operands = 0 : i64, tpu.core_type = #tpu.core_type<tc>, window_params = [{transform_indices = @transform_0, window_bounds = array<i64: 16, 32>}, {pipeline_mode = #tpu.pipeline_mode<synchronous>, transform_indices = @transform_1, window_bounds = array<i64: 32, 128>}, {pipeline_mode = #tpu.pipeline_mode<synchronous>, transform_indices = @transform_2, window_bounds = array<i64: 1, 128>}, {transform_indices = @transform_3, window_bounds = array<i64: 16, 128>}]} {
    %c0 = arith.constant 0 : index
    %c0_0 = arith.constant 0 : index
    %0 = vector.load %arg1[%c0, %c0_0] : memref<16x32xf32, #tpu.memory_space<vmem>>, vector<16x32xf32>
    %cst = arith.constant dense<0.000000e+00> : vector<16xf32>
    %1 = vector.multi_reduction <add>, %0, %cst [1] : vector<16x32xf32> to vector<16xf32>
    %2 = vector.shape_cast %1 : vector<16xf32> to vector<16x1xf32>
    %cst_1 = arith.constant 3.125000e-02 : f32
    %3 = vector.broadcast %cst_1 : f32 to vector<16x1xf32>
    %4 = arith.mulf %2, %3 : vector<16x1xf32>
    %5 = arith.mulf %0, %0 : vector<16x32xf32>
    %cst_2 = arith.constant dense<0.000000e+00> : vector<16xf32>
    %6 = vector.multi_reduction <add>, %5, %cst_2 [1] : vector<16x32xf32> to vector<16xf32>
    %7 = vector.shape_cast %6 : vector<16xf32> to vector<16x1xf32>
    %cst_3 = arith.constant 3.125000e-02 : f32
    %8 = vector.broadcast %cst_3 : f32 to vector<16x1xf32>
    %9 = arith.mulf %7, %8 : vector<16x1xf32>
    %10 = arith.mulf %4, %4 : vector<16x1xf32>
    %11 = arith.subf %9, %10 : vector<16x1xf32>
    %cst_4 = arith.constant 0.000000e+00 : f32
    %12 = vector.broadcast %cst_4 : f32 to vector<16x1xf32>
    %13 = arith.maximumf %11, %12 : vector<16x1xf32>
    %14 = vector.broadcast %4 : vector<16x1xf32> to vector<16x32xf32>
    %15 = arith.subf %0, %14 : vector<16x32xf32>
    %cst_5 = arith.constant 9.99999974E-6 : f32
    %16 = vector.broadcast %cst_5 : f32 to vector<16x1xf32>
    %17 = arith.addf %13, %16 : vector<16x1xf32>
    %18 = math.rsqrt %17 : vector<16x1xf32>
    %19 = vector.broadcast %18 : vector<16x1xf32> to vector<16x32xf32>
    %20 = arith.mulf %15, %19 : vector<16x32xf32>
    %c0_6 = arith.constant 0 : index
    %c0_7 = arith.constant 0 : index
    %21 = vector.load %arg2[%c0_6, %c0_7] : memref<32x128xf32, #tpu.memory_space<vmem>>, vector<32x128xf32>
    %cst_8 = arith.constant dense<0.000000e+00> : vector<16x128xf32>
    %22 = tpu.matmul %20, %21, %cst_8 {dimension_numbers = #tpu.dot_dimension_numbers<[1], [0], [0], [1], [0, 0, 1, 1], [], []>} : vector<16x32xf32>, vector<32x128xf32>, vector<16x128xf32> -> vector<16x128xf32>
    %c0_9 = arith.constant 0 : index
    %c0_10 = arith.constant 0 : index
    %23 = vector.load %arg3[%c0_9, %c0_10] : memref<1x128xf32, #tpu.memory_space<vmem>>, vector<1x128xf32>
    %24 = vector.broadcast %23 : vector<1x128xf32> to vector<16x128xf32>
    %25 = arith.addf %22, %24 : vector<16x128xf32>
    %c0_11 = arith.constant 0 : index
    %c0_12 = arith.constant 0 : index
    %26 = vector.load %arg4[%c0_11, %c0_12] : memref<16x128xf32, #tpu.memory_space<vmem>>, vector<16x128xf32>
    tpu.vector_store %arg4[%c0_11, %c0_12], %25 {strides = array<i32>} : memref<16x128xf32, #tpu.memory_space<vmem>>, vector<16x128xf32>,
    return
  }
  func.func @transform_0(%arg0: i32) -> (i32, i32) {
    %c0_i32 = arith.constant 0 : i32
    %c0_i32_0 = arith.constant 0 : i32
    return %arg0, %c0_i32 : i32, i32
  }
  func.func @transform_1(%arg0: i32) -> (i32, i32) {
    %c0_i32 = arith.constant 0 : i32
    %c0_i32_0 = arith.constant 0 : i32
    %c0_i32_1 = arith.constant 0 : i32
    return %c0_i32, %c0_i32_0 : i32, i32
  }
  func.func @transform_2(%arg0: i32) -> (i32, i32) {
    %c0_i32 = arith.constant 0 : i32
    %c0_i32_0 = arith.constant 0 : i32
    %c0_i32_1 = arith.constant 0 : i32
    return %c0_i32, %c0_i32_0 : i32, i32
  }
  func.func @transform_3(%arg0: i32) -> (i32, i32) {
    %c0_i32 = arith.constant 0 : i32
    %c0_i32_0 = arith.constant 0 : i32
    return %arg0, %c0_i32 : i32, i32
  }
}

</mosaic_0001>

<bundles_post_ra>
// kernel: tpu_custom_call.1
= control target key start
LH: loop header
LB: loop body
LE: loop exit
PB: predicated region body
PF: predicated region fallthrough
CT: control target
= control target key end

     0   :  { %8 = vsyncpa [#allocation3], 0  ;;  %s378_s0 = inlined_call_operand.hbm [shape: f32[16,32], index: 0, kind: input, shape index: {}]   ;;  %s379_s1 = inlined_call_operand.hbm [shape: f32[32,128], index: 1, kind: input, shape index: {}]   ;;  %s380_s2 = inlined_call_operand.vmem [shape: f32[1,128], index: 2, kind: input, shape index: {}]   ;;  %s381_s3 = inlined_call_operand.hbm [shape: f32[16,128], index: 3, kind: output, shape index: {}]  }
   0x1   :  { %9 = vsyncpa [#allocation6], 0 }
   0x2   :  { %10 = vsyncpa [#allocation4], 0  ;;  %s299_s12 = smov [#allocation2]   ;;  %s227_s16 = scalar_lea.hbm %s378_s0, 256 }
   0x3   :  { %s16_s13 = sshll.u32 %s299_s12, 4  ;;  %p228_p0 = scmp.ne.s32.totalorder %s378_s0, %s227_s16  ;;  %s17_s13 = int_to_ptr.vmem [resolvable:$true] %s16_s13 }
   0x4   :  { %p231_p1 = scmp.lt.u32.totalorder %s227_s16, %s378_s0 }
   0x6   :  { %p233_p2 = pnand %p231_p1, %p228_p0 }
   0x8   :  { %236 = shalt.err (!%p233_p2)
}
   0x9   :  { %s237_s21 = scalar_lea.vmem %s17_s13, 256  ;;  %p242_p4 = scmp.lt.s32.totalorder %s17_s13, %s17_s13 }
   0xa   :  { %p238_p3 = scmp.ne.s32.totalorder %s17_s13, %s237_s21  ;;  %p243_p5 = scmp.lt.s32.totalorder %s237_s21, %s237_s21 }
   0xc   :  { %p244_p6 = por %p243_p5, %p242_p4 }
   0xe   :  { %p245_p7 = pnand %p244_p6, %p238_p3 }
  0x10   :  { %248 = shalt.err (!%p245_p7)
}
  0x11   :  { %s300_s22 = smov 128   ;;  %s301_s23 = smov 8  }
  0x12   :  { %22 = dma.hbm_to_vmem [thread:$0]  %s378_s0, 256, %s17_s13, [#allocation3], %s300_s22, %s300_s22, %s301_s23  }
  0x13   :  { %s302_s26 = smov [#allocation5]   ;;  %s249_s30 = scalar_lea.hbm %s379_s1, 512 }
  0x14   :  { %s28_s27 = sshll.u32 %s302_s26, 4  ;;  %p250_p8 = scmp.ne.s32.totalorder %s379_s1, %s249_s30  ;;  %s29_s27 = int_to_ptr.vmem [resolvable:$true] %s28_s27 }
  0x15   :  { %p253_p9 = scmp.lt.u32.totalorder %s249_s30, %s379_s1 }
  0x17   :  { %p255_p10 = pnand %p253_p9, %p250_p8 }
  0x19   :  { %258 = shalt.err (!%p255_p10)
}
  0x1a   :  { %s259_s8 = scalar_lea.vmem %s29_s27, 512  ;;  %p264_p12 = scmp.lt.s32.totalorder %s29_s27, %s29_s27 }
  0x1b   :  { %p260_p11 = scmp.ne.s32.totalorder %s29_s27, %s259_s8  ;;  %p265_p13 = scmp.lt.s32.totalorder %s259_s8, %s259_s8 }
  0x1d   :  { %p266_p0 = por %p265_p13, %p264_p12 }
  0x1f   :  { %p267_p1 = pnand %p266_p0, %p260_p11 }
  0x21   :  { %270 = shalt.err (!%p267_p1)
}
  0x22   :  { %34 = dma.hbm_to_vmem [thread:$0]  %s379_s1, 512, %s29_s27, [#allocation6], %s300_s22, %s300_s22, %s301_s23  }
  0x23   :  { %293 = dma.done.wait [#allocation3], 256  }
  0x24   :  { %294 = vsyncadd [#allocation3], 4294967040 }
  0x25   :  { %295 = dma.done.wait [#allocation6], 512  }
  0x26   :  { %296 = vsyncadd [#allocation6], 4294966784  ;;  %vm45_vm0 = vcmask 261120   ;;  %v43_v0 = vld [vmem:[#allocation2] sm:$0xff]  ;;  %v44_v1 = vld [vmem:[#allocation2 + $0x8] sm:$0xff]  ;;  %s303_s11 = smov [#allocation7]  }
  0x27   :  { %v46_v2 = vsel %vm45_vm0, %v43_v0, 0.0  ;;  %v54_v3 = vmul.f32 %v43_v0, %v43_v0  ;;  %v55_v4 = vmul.f32 %v44_v1, %v44_v1  ;;  %v49_v6 = vsel %vm45_vm0, %v44_v1, 0.0  ;;  %v78_v8 = vld [vmem:[#allocation5] sm:$0xff]  ;;  %v79_v9 = vld [vmem:[#allocation5 + $0x8] sm:$0xff]  ;;  %v80_v10 = vld [vmem:[#allocation5 + $0x10] sm:$0xff]  ;;  %s177_s12 = sshll.u32 %s303_s11, 4  ;;  %s178_s12 = int_to_ptr.vmem [resolvable:$true] %s177_s12 }
  0x28   :  { %47 = vadd.xlane.f32.xlu0 %v46_v2  ;;  %v210_v11 = vpack.c.bf16 %v79_v9, %v78_v8  ;;  %v81_v12 = vld [vmem:[#allocation5 + $0x18] sm:$0xff]  ;;  %v190_v36 = vld [vmem:[%s380_s2] ss:$0 sm:$0xff]  ;;  %s271_s13 = scalar_lea.vmem %s178_s12, 256  ;;  %p276_p3 = scmp.lt.s32.totalorder %s178_s12, %s178_s12 }
  0x29   :  { %v56_v5 = vsel %vm45_vm0, %v54_v3, 0.0  ;;  %v59_v7 = vsel %vm45_vm0, %v55_v4, 0.0  ;;  %v214_v13 = vpack.c.bf16 %v81_v12, %v80_v10  ;;  %p272_p2 = scmp.ne.s32.totalorder %s178_s12, %s271_s13  ;;  %p277_p4 = scmp.lt.s32.totalorder %s271_s13, %s271_s13 }
  0x2a   :  { %57 = vadd.xlane.f32.xlu1 %v56_v5  ;;  %211 = vmatprep.subr.bf16.mxu0 %v210_v11 }
  0x2b   :  { %213 = vmatpush3.bf16.msra.mxu0 %v210_v11  ;;  %p278_p5 = por %p277_p4, %p276_p3 }
  0x2c   :  { %50 = vadd.xlane.f32.xlu0 %v49_v6  ;;  %215 = vmatprep.subr.bf16.mxu0 %v214_v13 }
  0x2d   :  { %p279_p6 = pnand %p278_p5, %p272_p2 }
  0x2e   :  { %60 = vadd.xlane.f32.xlu1 %v59_v7 }
  0x2f   :  { %217 = vmatpush3.bf16.msra.mxu0 %v214_v13 }
  0xb5   :  { %v48_v14 = vpop.xlane.xlu0 %47 }
  0xb6   :  { %v52_v15 = vmul.f32 0.03125, %v48_v14 }
  0xb7   :  { %v58_v16 = vpop.xlane.xlu1 %57 }
  0xb8   :  { %v64_v17 = vmul.f32 %v52_v15, %v52_v15  ;;  %v62_v18 = vmul.f32 0.03125, %v58_v16  ;;  %v70_v30 = vsub.f32 %v43_v0, %v52_v15 }
  0xb9   :  { %v51_v19 = vpop.xlane.xlu0 %50 }
  0xba   :  { %v66_v20 = vsub.f32 %v62_v18, %v64_v17  ;;  %v53_v21 = vmul.f32 0.03125, %v51_v19 }
  0xbb   :  { %v61_v22 = vpop.xlane.xlu1 %60 }
  0xbc   :  { %v68_v23 = vmax.f32 %v66_v20, 0.0  ;;  %v65_v24 = vmul.f32 %v53_v21, %v53_v21  ;;  %v63_v25 = vmul.f32 0.03125, %v61_v22  ;;  %v71_v33 = vsub.f32 %v44_v1, %v53_v21 }
  0xbe   :  { %v72_v26 = vadd.f32 1e-05, %v68_v23  ;;  %v67_v27 = vsub.f32 %v63_v25, %v65_v24 }
  0xc0   :  { %223 = vrsqrt.f32 %v72_v26  ;;  %v69_v28 = vmax.f32 %v67_v27, 0.0 }
  0xc2   :  { %v73_v29 = vadd.f32 1e-05, %v69_v28 }
  0xc4   :  { %225 = vrsqrt.f32 %v73_v29 }
  0xca   :  { %v224_v31 = vpop.eup %223 }
  0xcb   :  { %v76_v32 = vmul.f32 %v224_v31, %v70_v30 }
  0xcd   :  { %207 = vmatprep.mubr.msk.f32.mxu0 %vm45_vm0, %v76_v32 }
  0xce   :  { %v226_v34 = vpop.eup %225 }
  0xcf   :  { %v77_v35 = vmul.f32 %v226_v34, %v71_v33 }
  0xd1   :  { %208 = vmatmul.mubr.msk.f32.vlgmr.msra.gmra.mrb[0].mxu0 %vm45_vm0, %v77_v35 }
 0x1a4   :  { %v209_v37 = vpop.f32.mrb[0].mxu0 }
 0x1a5   :  { %v167_v38 = vadd.f32 %v209_v37, %v190_v36  ;;  %v161_v39 = vpop.f32.mrb[1].mxu0 }
 0x1a6   :  { %v162_v40 = vadd.f32 %v190_v36, %v161_v39 }
 0x1a7   :  { %171 = vst [vmem:[#allocation7 + $0x8] sm:$0xff] %v167_v38 }
 0x1a8   :  { %170 = vst [vmem:[#allocation7] sm:$0xff] %v162_v40 }
 0x1a9   :  { %282 = shalt.err (!%p279_p6)
}
 0x1aa   :  { %s283_s2 = scalar_lea.hbm %s381_s3, 256 }
 0x1ab   :  { %p284_p7 = scmp.ne.s32.totalorder %s381_s3, %s283_s2  ;;  %p287_p8 = scmp.lt.u32.totalorder %s283_s2, %s381_s3 }
 0x1ad   :  { %p289_p9 = pnand %p287_p8, %p284_p7 }
 0x1af   :  { %292 = shalt.err (!%p289_p9)
}
 0x1b0   :  { %183 = dma.vmem_to_hbm [thread:$0]  %s178_s12, 256, %s381_s3, [#allocation4], %s300_s22, %s300_s22, %s301_s23  }
 0x1b1   :  { %297 = dma.done.wait [#allocation4], 256  }
 0x1b2   :  { %298 = vsyncadd [#allocation4], 4294967040 }
 0x1b3   :  { %187 = vsyncpa [#allocation3], 1 }
 0x1b4   :  { %188 = vsyncpa [#allocation6], 1 }
 0x1b5   :  { %189 = vsyncpa [#allocation4], 1 }

// kernel: tpu_custom_call.1
= control target key start
LH: loop header
LB: loop body
LE: loop exit
PB: predicated region body
PF: predicated region fallthrough
CT: control target
= control target key end

     0   :  { %8 = vsyncpa [#allocation3], 0  ;;  %s378_s0 = inlined_call_operand.hbm [shape: f32[16,32], index: 0, kind: input, shape index: {}]   ;;  %s379_s1 = inlined_call_operand.hbm [shape: f32[32,128], index: 1, kind: input, shape index: {}]   ;;  %s380_s2 = inlined_call_operand.vmem [shape: f32[1,128], index: 2, kind: input, shape index: {}]   ;;  %s381_s3 = inlined_call_operand.hbm [shape: f32[16,128], index: 3, kind: output, shape index: {}]  }
   0x1   :  { %9 = vsyncpa [#allocation6], 0 }
   0x2   :  { %10 = vsyncpa [#allocation4], 0  ;;  %s299_s12 = smov [#allocation2]   ;;  %s227_s16 = scalar_lea.hbm %s378_s0, 256 }
   0x3   :  { %s16_s13 = sshll.u32 %s299_s12, 4  ;;  %p228_p0 = scmp.ne.s32.totalorder %s378_s0, %s227_s16  ;;  %s17_s13 = int_to_ptr.vmem [resolvable:$true] %s16_s13 }
   0x4   :  { %p231_p1 = scmp.lt.u32.totalorder %s227_s16, %s378_s0 }
   0x6   :  { %p233_p2 = pnand %p231_p1, %p228_p0 }
   0x8   :  { %236 = shalt.err (!%p233_p2)
}
   0x9   :  { %s237_s21 = scalar_lea.vmem %s17_s13, 256  ;;  %p242_p4 = scmp.lt.s32.totalorder %s17_s13, %s17_s13 }
   0xa   :  { %p238_p3 = scmp.ne.s32.totalorder %s17_s13, %s237_s21  ;;  %p243_p5 = scmp.lt.s32.totalorder %s237_s21, %s237_s21 }
   0xc   :  { %p244_p6 = por %p243_p5, %p242_p4 }
   0xe   :  { %p245_p7 = pnand %p244_p6, %p238_p3 }
  0x10   :  { %248 = shalt.err (!%p245_p7)
}
  0x11   :  { %s300_s22 = smov 128   ;;  %s301_s23 = smov 8  }
  0x12   :  { %22 = dma.hbm_to_vmem [thread:$0]  %s378_s0, 256, %s17_s13, [#allocation3], %s300_s22, %s300_s22, %s301_s23  }
  0x13   :  { %s302_s26 = smov [#allocation5]   ;;  %s249_s30 = scalar_lea.hbm %s379_s1, 512 }
  0x14   :  { %s28_s27 = sshll.u32 %s302_s26, 4  ;;  %p250_p8 = scmp.ne.s32.totalorder %s379_s1, %s249_s30  ;;  %s29_s27 = int_to_ptr.vmem [resolvable:$true] %s28_s27 }
  0x15   :  { %p253_p9 = scmp.lt.u32.totalorder %s249_s30, %s379_s1 }
  0x17   :  { %p255_p10 = pnand %p253_p9, %p250_p8 }
  0x19   :  { %258 = shalt.err (!%p255_p10)
}
  0x1a   :  { %s259_s8 = scalar_lea.vmem %s29_s27, 512  ;;  %p264_p12 = scmp.lt.s32.totalorder %s29_s27, %s29_s27 }
  0x1b   :  { %p260_p11 = scmp.ne.s32.totalorder %s29_s27, %s259_s8  ;;  %p265_p13 = scmp.lt.s32.totalorder %s259_s8, %s259_s8 }
  0x1d   :  { %p266_p0 = por %p265_p13, %p264_p12 }
  0x1f   :  { %p267_p1 = pnand %p266_p0, %p260_p11 }
  0x21   :  { %270 = shalt.err (!%p267_p1)
}
  0x22   :  { %34 = dma.hbm_to_vmem [thread:$0]  %s379_s1, 512, %s29_s27, [#allocation6], %s300_s22, %s300_s22, %s301_s23  }
  0x23   :  { %293 = dma.done.wait [#allocation3], 256  }
  0x24   :  { %294 = vsyncadd [#allocation3], 4294967040 }
  0x25   :  { %295 = dma.done.wait [#allocation6], 512  }
  0x26   :  { %296 = vsyncadd [#allocation6], 4294966784  ;;  %vm45_vm0 = vcmask 261120   ;;  %v43_v0 = vld [vmem:[#allocation2] sm:$0xff]  ;;  %v44_v1 = vld [vmem:[#allocation2 + $0x8] sm:$0xff]  ;;  %s303_s11 = smov [#allocation7]  }
  0x27   :  { %v46_v2 = vsel %vm45_vm0, %v43_v0, 0.0  ;;  %v54_v3 = vmul.f32 %v43_v0, %v43_v0  ;;  %v55_v4 = vmul.f32 %v44_v1, %v44_v1  ;;  %v49_v6 = vsel %vm45_vm0, %v44_v1, 0.0  ;;  %v78_v8 = vld [vmem:[#allocation5] sm:$0xff]  ;;  %v79_v9 = vld [vmem:[#allocation5 + $0x8] sm:$0xff]  ;;  %v80_v10 = vld [vmem:[#allocation5 + $0x10] sm:$0xff]  ;;  %s177_s12 = sshll.u32 %s303_s11, 4  ;;  %s178_s12 = int_to_ptr.vmem [resolvable:$true] %s177_s12 }
  0x28   :  { %47 = vadd.xlane.f32.xlu0 %v46_v2  ;;  %v210_v11 = vpack.c.bf16 %v79_v9, %v78_v8  ;;  %v81_v12 = vld [vmem:[#allocation5 + $0x18] sm:$0xff]  ;;  %v190_v36 = vld [vmem:[%s380_s2] ss:$0 sm:$0xff]  ;;  %s271_s13 = scalar_lea.vmem %s178_s12, 256  ;;  %p276_p3 = scmp.lt.s32.totalorder %s178_s12, %s178_s12 }
  0x29   :  { %v56_v5 = vsel %vm45_vm0, %v54_v3, 0.0  ;;  %v59_v7 = vsel %vm45_vm0, %v55_v4, 0.0  ;;  %v214_v13 = vpack.c.bf16 %v81_v12, %v80_v10  ;;  %p272_p2 = scmp.ne.s32.totalorder %s178_s12, %s271_s13  ;;  %p277_p4 = scmp.lt.s32.totalorder %s271_s13, %s271_s13 }
  0x2a   :  { %57 = vadd.xlane.f32.xlu1 %v56_v5  ;;  %211 = vmatprep.subr.bf16.mxu0 %v210_v11 }
  0x2b   :  { %213 = vmatpush3.bf16.msra.mxu0 %v210_v11  ;;  %p278_p5 = por %p277_p4, %p276_p3 }
  0x2c   :  { %50 = vadd.xlane.f32.xlu0 %v49_v6  ;;  %215 = vmatprep.subr.bf16.mxu0 %v214_v13 }
  0x2d   :  { %p279_p6 = pnand %p278_p5, %p272_p2 }
  0x2e   :  { %60 = vadd.xlane.f32.xlu1 %v59_v7 }
  0x2f   :  { %217 = vmatpush3.bf16.msra.mxu0 %v214_v13 }
  0xb5   :  { %v48_v14 = vpop.xlane.xlu0 %47 }
  0xb6   :  { %v52_v15 = vmul.f32 0.03125, %v48_v14 }
  0xb7   :  { %v58_v16 = vpop.xlane.xlu1 %57 }
  0xb8   :  { %v64_v17 = vmul.f32 %v52_v15, %v52_v15  ;;  %v62_v18 = vmul.f32 0.03125, %v58_v16  ;;  %v70_v30 = vsub.f32 %v43_v0, %v52_v15 }
  0xb9   :  { %v51_v19 = vpop.xlane.xlu0 %50 }
  0xba   :  { %v66_v20 = vsub.f32 %v62_v18, %v64_v17  ;;  %v53_v21 = vmul.f32 0.03125, %v51_v19 }
  0xbb   :  { %v61_v22 = vpop.xlane.xlu1 %60 }
  0xbc   :  { %v68_v23 = vmax.f32 %v66_v20, 0.0  ;;  %v65_v24 = vmul.f32 %v53_v21, %v53_v21  ;;  %v63_v25 = vmul.f32 0.03125, %v61_v22  ;;  %v71_v33 = vsub.f32 %v44_v1, %v53_v21 }
  0xbe   :  { %v72_v26 = vadd.f32 1e-05, %v68_v23  ;;  %v67_v27 = vsub.f32 %v63_v25, %v65_v24 }
  0xc0   :  { %223 = vrsqrt.f32 %v72_v26  ;;  %v69_v28 = vmax.f32 %v67_v27, 0.0 }
  0xc2   :  { %v73_v29 = vadd.f32 1e-05, %v69_v28 }
  0xc4   :  { %225 = vrsqrt.f32 %v73_v29 }
  0xca   :  { %v224_v31 = vpop.eup %223 }
  0xcb   :  { %v76_v32 = vmul.f32 %v224_v31, %v70_v30 }
  0xcd   :  { %207 = vmatprep.mubr.msk.f32.mxu0 %vm45_vm0, %v76_v32 }
  0xce   :  { %v226_v34 = vpop.eup %225 }
  0xcf   :  { %v77_v35 = vmul.f32 %v226_v34, %v71_v33 }
  0xd1   :  { %208 = vmatmul.mubr.msk.f32.vlgmr.msra.gmra.mrb[0].mxu0 %vm45_vm0, %v77_v35 }
 0x1a4   :  { %v209_v37 = vpop.f32.mrb[0].mxu0 }
 0x1a5   :  { %v167_v38 = vadd.f32 %v209_v37, %v190_v36  ;;  %v161_v39 = vpop.f32.mrb[1].mxu0 }
 0x1a6   :  { %v162_v40 = vadd.f32 %v190_v36, %v161_v39 }
 0x1a7   :  { %171 = vst [vmem:[#allocation7 + $0x8] sm:$0xff] %v167_v38 }
 0x1a8   :  { %170 = vst [vmem:[#allocation7] sm:$0xff] %v162_v40 }
 0x1a9   :  { %282 = shalt.err (!%p279_p6)
}
 0x1aa   :  { %s283_s2 = scalar_lea.hbm %s381_s3, 256 }
 0x1ab   :  { %p284_p7 = scmp.ne.s32.totalorder %s381_s3, %s283_s2  ;;  %p287_p8 = scmp.lt.u32.totalorder %s283_s2, %s381_s3 }
 0x1ad   :  { %p289_p9 = pnand %p287_p8, %p284_p7 }
 0x1af   :  { %292 = shalt.err (!%p289_p9)
}
 0x1b0   :  { %183 = dma.vmem_to_hbm [thread:$0]  %s178_s12, 256, %s381_s3, [#allocation4], %s300_s22, %s300_s22, %s301_s23  }
 0x1b1   :  { %297 = dma.done.wait [#allocation4], 256  }
 0x1b2   :  { %298 = vsyncadd [#allocation4], 4294967040 }
 0x1b3   :  { %187 = vsyncpa [#allocation3], 1 }
 0x1b4   :  { %188 = vsyncpa [#allocation6], 1 }
 0x1b5   :  { %189 = vsyncpa [#allocation4], 1 }

</bundles_post_ra>
